<compile_context>
chip_gen: v6e
topology: v6e:2x2x1
jax: 0.10.0
libtpu: 0.0.40
codegen_flags: <defaults>
</compile_context>

<pallas_src>
import math
import numpy as np
import jax
import jax.numpy as jnp
from jax import lax
from jax.experimental import pallas as pl
from jax.experimental.pallas import tpu as pltpu

EPS = 1e-8

_VMEM_TILE_BUDGET = 40 * 1024 * 1024   # per-step tile budget, safe on v7x (64 MiB VMEM)
_VMEM_LIMIT_BYTES = 48 * 1024 * 1024   # below v7x physical VMEM; plenty on v5e/v6e
_TILE_M_CAP = 2048


def _round_up(x, m):
    return ((x + m - 1) // m) * m


# ----------------------------- Pallas kernel ----------------------------------
def _vdrop_conv_kernel(p_ref, wmu_ref, wvar_ref, b_ref, noise_ref, o_ref):
    # p_ref:     (TM, K_pad)   bf16 im2col patches of x
    # wmu_ref:   (K_pad, T_OC) bf16 weight means
    # wvar_ref:  (K_pad, T_OC) bf16 weight variances
    # b_ref:     (1, T_OC)     f32 bias
    # noise_ref: (TM, T_OC)    bf16 standard-normal noise
    # o_ref:     (TM, T_OC)    f32 output
    p_bf16 = p_ref[...]
    # variance path: square the (bf16-rounded) patches in f32, cast once for the MXU
    p_f32 = p_bf16.astype(jnp.float32)
    p2_bf16 = (p_f32 * p_f32).astype(jnp.bfloat16)

    y_mu = jnp.dot(p_bf16, wmu_ref[...], preferred_element_type=jnp.float32)
    y_mu = y_mu + b_ref[...]
    y_var = jnp.dot(p2_bf16, wvar_ref[...], preferred_element_type=jnp.float32)
    y_sigma = jnp.sqrt(jnp.maximum(y_var, EPS))
    o_ref[...] = y_mu + y_sigma * noise_ref[...].astype(jnp.float32)


# ------------------------------ host wrappers ----------------------------------
def _plan_tiles(M, K, OC):
    K_pad = _round_up(K, 16)       # bf16 native (16,128) sublane tiling for the K dim
    OC_pad = _round_up(OC, 128)    # lane-dense output / MXU N dim
    tile_oc = 256 if OC_pad % 256 == 0 else 128
    # VMEM per grid step (pipeline double-buffers every streamed operand):
    #   bf16 patches : 2 * tile_m * K_pad * 2 B
    #   bf16 noise   : 2 * tile_m * tile_oc * 2 B
    #   f32 output   : 2 * tile_m * tile_oc * 4 B
    #   bf16 weights : 2 * 2 * K_pad * tile_oc * 2 B   (resident across inner M loop)
    #   f32 bias     : 2 * tile_oc * 4 B
    fixed = 2 * 2 * K_pad * tile_oc * 2 + 2 * tile_oc * 4
    per_m = 2 * K_pad * 2 + 2 * tile_oc * 2 + 2 * tile_oc * 4
    tile_m = max(16, min(_TILE_M_CAP, (_VMEM_TILE_BUDGET - fixed) // per_m))
    tile_m = (tile_m // 16) * 16
    tile_m = min(tile_m, _round_up(M, 16))
    # v7x megacore: make sure the parallel grid has >= 2 steps when OC fits one tile
    n_oc = OC_pad // tile_oc
    if n_oc == 1 and M > 16 and -(-M // tile_m) < 2:
        tile_m = _round_up(-(-M // 2), 16)
    M_pad = _round_up(M, tile_m)
    return M_pad, K_pad, OC_pad, tile_m, tile_oc


def _im2col(x, KH, KW, OH, OW, stride, padding, dilation):
    """(N, C, H, W) f32 -> (M, K) f32 patches, feature order (c, kh, kw)."""
    N, C, H, W = x.shape
    sh, sw = stride
    ph, pw = padding
    dh, dw = dilation
    x_p = jnp.pad(x, ((0, 0), (0, 0), (ph, ph), (pw, pw)))
    pieces = []
    for kh in range(KH):
        for kw in range(KW):
            h0 = kh * dh
            w0 = kw * dw
            pieces.append(x_p[:, :, h0:h0 + sh * (OH - 1) + 1:sh,
                                    w0:w0 + sw * (OW - 1) + 1:sw])  # (N, C, OH, OW)
    patches = jnp.stack(pieces, axis=0).reshape(KH, KW, N, C, OH, OW)
    patches = patches.transpose(2, 4, 5, 3, 0, 1).reshape(N * OH * OW, C * KH * KW)
    return patches


def vdrop_conv2d_forward(x, w_mu, w_var, bias, noise_key, *, stride=(1, 1),
                         padding=(0, 0), dilation=(1, 1)):
    """x: (N, C, H, W) f32.  w_mu/w_var: (OC, C, KH, KW) f32.  bias: (OC,) f32.
    noise_key: jax PRNG key for the activation noise.  Returns (N, OC, OH, OW) f32."""
    N, C, H, W = x.shape
    OC, _, KH, KW = w_mu.shape
    sh, sw = stride
    ph, pw = padding
    dh, dw = dilation
    OH = (H + 2 * ph - dh * (KH - 1) - 1) // sh + 1
    OW = (W + 2 * pw - dw * (KW - 1) - 1) // sw + 1
    M = N * OH * OW
    K = C * KH * KW

    M_pad, K_pad, OC_pad, tile_m, tile_oc = _plan_tiles(M, K, OC)

    # ---- host glue: im2col, pad + cast to bf16 (fused by XLA) ----
    # TODO(synk): fuse im2col into the kernel (implicit GEMM) to avoid the KH*KW
    #             inflation of the activation stream.
    patches = _im2col(x, KH, KW, OH, OW, stride, padding, dilation)   # (M, K) f32
    p_bf16 = jnp.pad(patches, ((0, M_pad - M), (0, K_pad - K))).astype(jnp.bfloat16)

    pad_ko = ((0, K_pad - K), (0, OC_pad - OC))
    wmu_mat = jnp.pad(w_mu.reshape(OC, K).T, pad_ko).astype(jnp.bfloat16)   # (K_pad, OC_pad)
    wvar_mat = jnp.pad(w_var.reshape(OC, K).T, pad_ko).astype(jnp.bfloat16)
    bias_mat = jnp.pad(bias.reshape(1, OC), ((0, 0), (0, OC_pad - OC))).astype(jnp.float32)

    # Host-generated N(0,1) noise (the TPU-resident PRNG has no CPU/interpret
    # lowering); streamed in bf16 to halve its HBM bytes.
    noise = jax.random.normal(noise_key, (M_pad, OC_pad), jnp.float32).astype(jnp.bfloat16)

    n_oc = OC_pad // tile_oc
    n_m = M_pad // tile_m
    # OC-major grid: the weight/bias blocks keep the same block index across the
    # whole inner M loop, so the pipeline keeps them resident instead of re-DMAing.
    grid = (n_oc, n_m)
    out = pl.pallas_call(
        _vdrop_conv_kernel,
        out_shape=jax.ShapeDtypeStruct((M_pad, OC_pad), jnp.float32),
        grid=grid,
        in_specs=[
            pl.BlockSpec((tile_m, K_pad), lambda j, i: (i, 0)),
            pl.BlockSpec((K_pad, tile_oc), lambda j, i: (0, j)),
            pl.BlockSpec((K_pad, tile_oc), lambda j, i: (0, j)),
            pl.BlockSpec((1, tile_oc), lambda j, i: (0, j)),
            pl.BlockSpec((tile_m, tile_oc), lambda j, i: (i, j)),
        ],
        out_specs=pl.BlockSpec((tile_m, tile_oc), lambda j, i: (i, j)),
        compiler_params=pltpu.CompilerParams(
            dimension_semantics=("parallel", "parallel"),
            vmem_limit_bytes=_VMEM_LIMIT_BYTES),
    )(p_bf16, wmu_mat, wvar_mat, bias_mat, noise)

    out = out[:M, :OC].reshape(N, OH, OW, OC).transpose(0, 3, 1, 2)   # -> NCHW
    return out


# --------------------------------- reference ------------------------------------
def _reference(x, w_mu, w_var, bias, noise_nchw, stride, padding, dilation):
    dn = ("NCHW", "OIHW", "NCHW")
    conv = lambda a, w: lax.conv_general_dilated(
        a, w, window_strides=stride,
        padding=[(padding[0], padding[0]), (padding[1], padding[1])],
        rhs_dilation=dilation, dimension_numbers=dn)
    # match the kernel's mixed precision: bf16-rounded operands, in-kernel square
    # of the bf16-rounded patches (f32 square, bf16 cast), f32 accumulation
    xb = x.astype(jnp.bfloat16).astype(jnp.float32)
    x2b = (xb * xb).astype(jnp.bfloat16).astype(jnp.float32)
    wmub = w_mu.astype(jnp.bfloat16).astype(jnp.float32)
    wvarb = w_var.astype(jnp.bfloat16).astype(jnp.float32)
    y_var = conv(x2b, wvarb)
    y_sigma = jnp.sqrt(jnp.maximum(y_var, EPS))
    y_mu = conv(xb, wmub) + bias.reshape(1, -1, 1, 1)
    return y_mu + y_sigma * noise_nchw


# ----------------------------------- main ----------------------------------------
if __name__ == "__main__":
    key = jax.random.PRNGKey(0)
    k_x, k_wmu, k_bias, k_noise = jax.random.split(key, 4)

    # small shapes consistent with the module
    N, C, H, W = 2, 4, 16, 16
    OC, KH, KW = 8, 3, 3
    stride, padding, dilation = (1, 1), (1, 1), (1, 1)
    z_logvar_init = -10.0  # central_data.z_logvar_init

    # deterministic parameter init (mirrors kaiming_uniform_(a=sqrt(5)))
    fan_in = C * KH * KW
    bound = 1.0 / math.sqrt(fan_in)
    w_mu = jax.random.uniform(k_wmu, (OC, C, KH, KW), jnp.float32, -bound, bound)
    w_var = jnp.exp(jnp.full((OC, C, KH, KW), z_logvar_init, jnp.float32))
    bias = jax.random.uniform(k_bias, (OC,), jnp.float32, -bound, bound)
    x = jax.random.normal(k_x, (N, C, H, W), jnp.float32)

    y = vdrop_conv2d_forward(x, w_mu, w_var, bias, k_noise,
                             stride=stride, padding=padding, dilation=dilation)
    y = jax.block_until_ready(y)

    # ---- exact reference check: regenerate the same noise, then compare ----
    OH = (H + 2 * padding[0] - dilation[0] * (KH - 1) - 1) // stride[0] + 1
    OW = (W + 2 * padding[1] - dilation[1] * (KW - 1) - 1) // stride[1] + 1
    M = N * OH * OW
    K = C * KH * KW
    M_pad, K_pad, OC_pad, tile_m, tile_oc = _plan_tiles(M, K, OC)

    noise_full = jax.random.normal(k_noise, (M_pad, OC_pad), jnp.float32)
    noise_full = noise_full.astype(jnp.bfloat16).astype(jnp.float32)
    noise_nchw = noise_full[:M, :OC].reshape(N, OH, OW, OC).transpose(0, 3, 1, 2)

    y_ref = _reference(x, w_mu, w_var, bias, noise_nchw, stride, padding, dilation)
    np.testing.assert_allclose(np.asarray(y), np.asarray(y_ref), rtol=2e-3, atol=2e-3)

    print("KERNEL_OK")
</pallas_src>

<mosaic_0001>
module attributes {stable_mosaic.version = 11 : i64} {
  func.func @_vdrop_conv_kernel(%arg0: i32, %arg1: i32, %arg2: memref<256x48xbf16, #tpu.memory_space<vmem>>, %arg3: memref<48x128xbf16, #tpu.memory_space<vmem>>, %arg4: memref<48x128xbf16, #tpu.memory_space<vmem>>, %arg5: memref<1x128xf32, #tpu.memory_space<vmem>>, %arg6: memref<256x128xbf16, #tpu.memory_space<vmem>>, %arg7: memref<256x128xf32, #tpu.memory_space<vmem>>) attributes {dimension_semantics = [#tpu.dimension_semantics<parallel>, #tpu.dimension_semantics<parallel>], iteration_bounds = array<i64: 1, 2>, scalar_prefetch = 0 : i64, scratch_operands = 0 : i64, tpu.core_type = #tpu.core_type<tc>, window_params = [{transform_indices = @transform_0, window_bounds = array<i64: 256, 48>}, {transform_indices = @transform_1, window_bounds = array<i64: 48, 128>}, {transform_indices = @transform_2, window_bounds = array<i64: 48, 128>}, {transform_indices = @transform_3, window_bounds = array<i64: 1, 128>}, {transform_indices = @transform_4, window_bounds = array<i64: 256, 128>}, {transform_indices = @transform_5, window_bounds = array<i64: 256, 128>}]} {
    %c0 = arith.constant 0 : index
    %c0_0 = arith.constant 0 : index
    %0 = vector.load %arg2[%c0, %c0_0] : memref<256x48xbf16, #tpu.memory_space<vmem>>, vector<256x48xbf16>
    %1 = arith.extf %0 : vector<256x48xbf16> to vector<256x48xf32>
    %2 = arith.mulf %1, %1 : vector<256x48xf32>
    %3 = arith.truncf %2 : vector<256x48xf32> to vector<256x48xbf16>
    %c0_1 = arith.constant 0 : index
    %c0_2 = arith.constant 0 : index
    %4 = vector.load %arg3[%c0_1, %c0_2] : memref<48x128xbf16, #tpu.memory_space<vmem>>, vector<48x128xbf16>
    %cst = arith.constant dense<0.000000e+00> : vector<256x128xf32>
    %5 = tpu.matmul %0, %4, %cst {dimension_numbers = #tpu.dot_dimension_numbers<[1], [0], [0], [1], [0, 0, 1, 1], [], []>} : vector<256x48xbf16>, vector<48x128xbf16>, vector<256x128xf32> -> vector<256x128xf32>
    %c0_3 = arith.constant 0 : index
    %c0_4 = arith.constant 0 : index
    %6 = vector.load %arg5[%c0_3, %c0_4] : memref<1x128xf32, #tpu.memory_space<vmem>>, vector<1x128xf32>
    %7 = vector.broadcast %6 : vector<1x128xf32> to vector<256x128xf32>
    %8 = arith.addf %5, %7 : vector<256x128xf32>
    %c0_5 = arith.constant 0 : index
    %c0_6 = arith.constant 0 : index
    %9 = vector.load %arg4[%c0_5, %c0_6] : memref<48x128xbf16, #tpu.memory_space<vmem>>, vector<48x128xbf16>
    %cst_7 = arith.constant dense<0.000000e+00> : vector<256x128xf32>
    %10 = tpu.matmul %3, %9, %cst_7 {dimension_numbers = #tpu.dot_dimension_numbers<[1], [0], [0], [1], [0, 0, 1, 1], [], []>} : vector<256x48xbf16>, vector<48x128xbf16>, vector<256x128xf32> -> vector<256x128xf32>
    %cst_8 = arith.constant 9.99999993E-9 : f32
    %11 = vector.broadcast %cst_8 : f32 to vector<256x128xf32>
    %12 = arith.maximumf %10, %11 : vector<256x128xf32>
    %13 = math.sqrt %12 : vector<256x128xf32>
    %c0_9 = arith.constant 0 : index
    %c0_10 = arith.constant 0 : index
    %14 = vector.load %arg6[%c0_9, %c0_10] : memref<256x128xbf16, #tpu.memory_space<vmem>>, vector<256x128xbf16>
    %15 = arith.extf %14 : vector<256x128xbf16> to vector<256x128xf32>
    %16 = arith.mulf %13, %15 : vector<256x128xf32>
    %17 = arith.addf %8, %16 : vector<256x128xf32>
    %c0_11 = arith.constant 0 : index
    %c0_12 = arith.constant 0 : index
    %18 = vector.load %arg7[%c0_11, %c0_12] : memref<256x128xf32, #tpu.memory_space<vmem>>, vector<256x128xf32>
    tpu.vector_store %arg7[%c0_11, %c0_12], %17 {strides = array<i32>} : memref<256x128xf32, #tpu.memory_space<vmem>>, vector<256x128xf32>,
    return
  }
  func.func @transform_0(%arg0: i32, %arg1: i32) -> (i32, i32) {
    %c0_i32 = arith.constant 0 : i32
    %c0_i32_0 = arith.constant 0 : i32
    return %arg1, %c0_i32 : i32, i32
  }
  func.func @transform_1(%arg0: i32, %arg1: i32) -> (i32, i32) {
    %c0_i32 = arith.constant 0 : i32
    %c0_i32_0 = arith.constant 0 : i32
    return %c0_i32, %arg0 : i32, i32
  }
  func.func @transform_2(%arg0: i32, %arg1: i32) -> (i32, i32) {
    %c0_i32 = arith.constant 0 : i32
    %c0_i32_0 = arith.constant 0 : i32
    return %c0_i32, %arg0 : i32, i32
  }
  func.func @transform_3(%arg0: i32, %arg1: i32) -> (i32, i32) {
    %c0_i32 = arith.constant 0 : i32
    %c0_i32_0 = arith.constant 0 : i32
    return %c0_i32, %arg0 : i32, i32
  }
  func.func @transform_4(%arg0: i32, %arg1: i32) -> (i32, i32) {
    %c0_i32 = arith.constant 0 : i32
    return %arg1, %arg0 : i32, i32
  }
  func.func @transform_5(%arg0: i32, %arg1: i32) -> (i32, i32) {
    %c0_i32 = arith.constant 0 : i32
    return %arg1, %arg0 : i32, i32
  }
}

</mosaic_0001>

<bundles_post_ra>
// kernel: tpu_custom_call.1
= control target key start
LH: loop header
LB: loop body
LE: loop exit
PB: predicated region body
PF: predicated region fallthrough
CT: control target
= control target key end

     0   :  { %10 = vsyncpa [#allocation3], 0  ;;  %s2877_s0 = inlined_call_operand.vmem [shape: bf16[512,48], index: 0, kind: input, shape index: {}]   ;;  %s2878_s1 = inlined_call_operand.vmem [shape: bf16[48,128], index: 1, kind: input, shape index: {}]   ;;  %s2879_s2 = inlined_call_operand.vmem [shape: bf16[48,128], index: 2, kind: input, shape index: {}]   ;;  %s2880_s3 = inlined_call_operand.vmem [shape: f32[1,128], index: 3, kind: input, shape index: {}]   ;;  %s2881_s4 = inlined_call_operand.vmem [shape: bf16[512,128], index: 4, kind: input, shape index: {}]   ;;  %s2882_s5 = inlined_call_operand.hbm [shape: f32[512,128], index: 5, kind: output, shape index: {}]  }
   0x1   :  { %12 = vsyncpa [#allocation3 + $0x1], 0  ;;  %s2085_s18 = smov 0   ;;  %s2087_s19 = smov 0  }
   0x2   :  { %s2089_s20 = smov 0   ;;  %s2091_s21 = smov 0  }
   0x3   :  { %s2093_s22 = smov 0   ;;  %s2095_s23 = smov 0  }
   0x4 LB: > { %s1548_s24 = sadd.s32 4294967295, %s2050_s23   ;;  %s1549_s25 = sadd.s32 4294967294, %s2050_s23   ;;  %s2050_s23 = sphi %s2095_s23, %s18_s23   ;;  %s2046_s22 = sphi %s2093_s22, %s2904_s22   ;;  %s2042_s21 = sphi %s2091_s21, %s2903_s21   ;;  %s2038_s20 = sphi %s2089_s20, %s2902_s20   ;;  %s2034_s19 = sphi %s2087_s19, %s2901_s19   ;;  %s2030_s18 = sphi %s2085_s18, %s2900_s18  }
   0x5   : > { %s27_s26 = sadd.s32 1, %s2046_s22  ;;  %s171_s27 = sadd.s32 1, %s2038_s20 }
   0x6   : > { %p28_p0 = scmp.ge.s32.totalorder %s27_s26, 2  ;;  %p181_p1 = scmp.ne.s32.totalorder %s2038_s20, %s2034_s19 }
   0x7   : > { %p182_p2 = scmp.eq.s32.totalorder %s1548_s24, 1  ;;  %p187_p3 = scmp.ne.s32.totalorder %s2034_s19, %s2030_s18 }
   0x8   : > { %s2906_s26 = smov (%p28_p0, %s27_s26), 0  ;;  %p188_p5 = scmp.eq.s32.totalorder %s1549_s25, 1 }
   0x9   : > { %p2125_p4 = por %p182_p2, %p181_p1  ;;  %s166_s29 = ssub.s32 %s2046_s22, %s2906_s26 }
   0xa   : > { %p1555_p6 = scmp.ge.s32.totalorder %s2050_s23, 1  ;;  %p169_p7 = scmp.eq.s32.totalorder %s166_s29, 0 }
   0xb   : > { %p2132_p8 = por %p188_p5, %p187_p3  ;;  %p247_p9 = scmp.lt.s32.totalorder %s2050_s23, 3 }
   0xc   : > { %s2138_s6 = scalar_select %p169_p7, %s2038_s20, %s171_s27  }
   0xd   : > { %p248_p10 = pnand %p1555_p6, %p247_p9 }
   0xe   : > { %s1557_s9 = sshll.u32 (!%p248_p10), %s2042_s21, 5  ;;  %s291_s14 = sand.u32 (!%p248_p10), 1, %s2034_s19  }
   0xf   : > { %251 = sbr.rel (%p248_p10) target bundleno = 343 (0x157), region = 40  ;;  %p295_p11 = scmp.lt.s32.totalorder (!%p248_p10), %s1557_s9, 63 }
  0x10   : > { %s2361_s15 = sshll.u32 (!%p248_p10), %s291_s14, 8  ;;  %s1621_s17 = sshll.u32 (!%p248_p10), %s2042_s21, 12 }
  0x11   : > { %s2418_s16 = scalar_lea.vmem (!%p248_p10), [#allocation2], %s2361_s15  ;;  %s2832_s21 = scalar_lea.sflag (!%p248_p10), [#allocation3], %s291_s14 }
  0x12   : > { %s2052_s8 = smov (!%p248_p10), [#allocation2]  }
  0x13   : > { %s1978_s10 = sshll.u32 (!%p248_p10), %s2052_s8, 4  ;;  %s1979_s10 = int_to_ptr.vmem [resolvable:$false] %s1978_s10 }
  0x14   : > { %v1872_v0 = vld [vmem:[%s2879_s2 + $0x10] sm:$0xff]   ;;  %v1873_v1 = vld [vmem:[%s2879_s2 + $0x8] sm:$0xff]   ;;  %v1874_v2 = vld [vmem:[%s2879_s2] sm:$0xff]   ;;  %s2908_s9 = smov (!%p295_p11, %s1557_s9), 63  ;;  %vm545_vm0 = vcmask 392192   ;;  %s1980_s11 = scalar_lea.vmem %s1979_s10, 8192 }
  0x15   : > { %1777 = vmatprep.subr.bf16.mxu1 %v1872_v0  ;;  %v1875_v3 = vld [vmem:[%s2878_s1 + $0x10] sm:$0xff]   ;;  %v1876_v4 = vld [vmem:[%s2878_s1 + $0x8] sm:$0xff]   ;;  %s1558_s24 = sshll.u32 %s2908_s9, 2  ;;  %v1877_v13 = vld [vmem:[%s2878_s1] sm:$0xff]  }
  0x16   : > { %1778 = vmatpush3.bf16.msra.mxu1 %v1872_v0  ;;  %1739 = vmatprep.subr.bf16.mxu0 %v1875_v3  ;;  %s2164_s29 = scalar_lea.vmem %s2877_s0, %s1558_s24  ;;  %s2222_s12 = scalar_lea.vmem %s2881_s4, %s1558_s24 }
  0x17   : > { %1779 = vmatprep.subr.bf16.mxu1 %v1873_v1  ;;  %1740 = vmatpush3.bf16.msra.mxu0 %v1875_v3  ;;  %v322_v5 = vld [vmem:[%s2164_s29] sm:$0xff]   ;;  %v324_v6 = vld [vmem:[%s2164_s29 + $0x8] sm:$0xff]   ;;  %v326_v7 = vld [vmem:[%s2164_s29 + $0x10] sm:$0xff]   ;;  %s1419_s24 = sshll.u32 %s2418_s16, 4  ;;  %s2826_s24 = int_to_ptr.vmem [resolvable:$true] %s1419_s24 }
  0x18   : > { %1741 = vmatprep.subr.bf16.mxu0 %v1876_v4  ;;  %v354_v8 = vunpack.c.l.bf16 %v322_v5  ;;  %v355_v9 = vunpack.c.h.bf16 %v322_v5  ;;  %v356_v10 = vunpack.c.l.bf16 %v324_v6  ;;  %v357_v11 = vunpack.c.h.bf16 %v324_v6  ;;  %v328_v12 = vld [vmem:[%s2164_s29 + $0x18] sm:$0xff]   ;;  %v330_v20 = vld [vmem:[%s2164_s29 + $0x20] sm:$0xff]   ;;  %1745 = vmatprep.mubr.msk.bf16.mxu0 %vm545_vm0, %v322_v5  ;;  %v332_v34 = vld [vmem:[%s2164_s29 + $0x28] sm:$0xff]   ;;  %s1974_s7 = scalar_lea.vmem %s2826_s24, 4096  ;;  %p1981_p1 = scmp.lt.s32.totalorder %s2826_s24, %s1979_s10 }
  0x19   : > { %v358_v14 = vunpack.c.l.bf16 %v326_v7  ;;  %v359_v15 = vunpack.c.h.bf16 %v326_v7  ;;  %v360_v23 = vunpack.c.l.bf16 %v328_v12  ;;  %v361_v24 = vunpack.c.h.bf16 %v328_v12  ;;  %v334_v35 = vld [vmem:[%s2164_s29 + $0x30] sm:$0xff]   ;;  %v336_v46 = vld [vmem:[%s2164_s29 + $0x38] sm:$0xff]   ;;  %v338_v47 = vld [vmem:[%s2164_s29 + $0x40] sm:$0xff]   ;;  %p1975_p12 = scmp.ne.s32.totalorder %s2826_s24, %s1974_s7  ;;  %p1982_p2 = scmp.lt.s32.totalorder %s1980_s11, %s1974_s7 }
  0x1a   : > { %1780 = vmatpush3.bf16.msra.mxu1 %v1873_v1  ;;  %v386_v16 = vmul.f32 %v354_v8, %v354_v8  ;;  %v387_v17 = vmul.f32 %v355_v9, %v355_v9  ;;  %v388_v18 = vmul.f32 %v356_v10, %v356_v10  ;;  %v389_v19 = vmul.f32 %v357_v11, %v357_v11  ;;  %v340_v58 = vld [vmem:[%s2164_s29 + $0x48] sm:$0xff]   ;;  %v342_v59 = vld [vmem:[%s2164_s29 + $0x50] sm:$0xff]  }
  0x1b   : > { %1781 = vmatprep.subr.bf16.mxu1 %v1874_v2  ;;  %1742 = vmatpush3.bf16.msra.mxu0 %v1876_v4  ;;  %v390_v21 = vmul.f32 %v358_v14, %v358_v14  ;;  %v391_v22 = vmul.f32 %v359_v15, %v359_v15  ;;  %v362_v28 = vunpack.c.l.bf16 %v330_v20  ;;  %v363_v29 = vunpack.c.h.bf16 %v330_v20  ;;  %p1976_p13 = pnand %p1975_p12, %p2125_p4  ;;  %p1983_p3 = por %p1982_p2, %p1981_p1 }
  0x1c   : > { %v418_v25 = vpack.c.bf16 %v387_v17, %v386_v16  ;;  %v419_v26 = vpack.c.bf16 %v389_v19, %v388_v18  ;;  %1743 = vmatprep.subr.bf16.mxu0 %v1877_v13  ;;  %v392_v30 = vmul.f32 %v360_v23, %v360_v23  ;;  %v393_v31 = vmul.f32 %v361_v24, %v361_v24  ;;  %v348_v18 = vld [vmem:[%s2164_s29 + $0x68] sm:$0xff]   ;;  %v350_v19 = vld [vmem:[%s2164_s29 + $0x70] sm:$0xff]  }
  0x1d   : > { %v420_v27 = vpack.c.bf16 %v391_v22, %v390_v21  ;;  %v394_v32 = vmul.f32 %v362_v28, %v362_v28  ;;  %v395_v33 = vmul.f32 %v363_v29, %v363_v29  ;;  %v364_v37 = vunpack.c.l.bf16 %v332_v34  ;;  %p1977_p0 = pneg %p1976_p13 }
  0x1e   : > { %1782 = vmatpush3.bf16.msra.mxu1 %v1874_v2  ;;  %1783 = vmatprep.mubr.msk.bf16.mxu1 %vm545_vm0, %v418_v25  ;;  %v421_v36 = vpack.c.bf16 %v393_v31, %v392_v30  ;;  %v365_v38 = vunpack.c.h.bf16 %v332_v34  ;;  %v366_v40 = vunpack.c.l.bf16 %v334_v35  ;;  %v367_v41 = vunpack.c.h.bf16 %v334_v35  ;;  %v352_v30 = vld [vmem:[%s2164_s29 + $0x78] sm:$0xff]  }
  0x1f   : > { %1744 = vmatpush3.bf16.msra.mxu0 %v1877_v13  ;;  %v422_v39 = vpack.c.bf16 %v395_v33, %v394_v32  ;;  %v396_v42 = vmul.f32 %v364_v37, %v364_v37  ;;  %v368_v49 = vunpack.c.l.bf16 %v336_v46  ;;  %v369_v50 = vunpack.c.h.bf16 %v336_v46  ;;  %p1984_p5 = pnand %p1983_p3, %p1977_p0 }
  0x20   : > { %v397_v43 = vmul.f32 %v365_v38, %v365_v38  ;;  %v398_v44 = vmul.f32 %v366_v40, %v366_v40  ;;  %v399_v45 = vmul.f32 %v367_v41, %v367_v41  ;;  %v370_v52 = vunpack.c.l.bf16 %v338_v47  ;;  %v2228_v40 = vld [vmem:[%s2222_s12] sm:$0xff]  }
  0x21   : > { %1784 = vmatmul.mubr.msk.bf16.vlgmr.msra.gmra.mxu1 %vm545_vm0, %v419_v26  ;;  %v371_v53 = vunpack.c.h.bf16 %v338_v47  ;;  %v400_v54 = vmul.f32 %v368_v49, %v368_v49  ;;  %v401_v55 = vmul.f32 %v369_v50, %v369_v50  ;;  %v372_v61 = vunpack.c.l.bf16 %v340_v58  ;;  %v2244_v49 = vld [vmem:[%s2222_s12 + $0x28] sm:$0xff]   ;;  %v2247_v50 = vld [vmem:[%s2222_s12 + $0x20] sm:$0xff]  }
  0x22   : > { %1787 = vmatprep.mubr.msk.bf16.mxu1 %vm545_vm0, %v420_v27  ;;  %1746 = vmatmul.mubr.msk.bf16.vlgmr.msra.gmra.mxu0 %vm545_vm0, %v324_v6  ;;  %v423_v48 = vpack.c.bf16 %v397_v43, %v396_v42  ;;  %v424_v51 = vpack.c.bf16 %v399_v45, %v398_v44  ;;  %v402_v56 = vmul.f32 %v370_v52, %v370_v52  ;;  %v373_v62 = vunpack.c.h.bf16 %v340_v58  ;;  %v344_v6 = vld [vmem:[%s2164_s29 + $0x58] sm:$0xff]   ;;  %v2236_v43 = vld [vmem:[%s2222_s12 + $0x10] sm:$0xff]  }
  0x23   : > { %1749 = vmatprep.mubr.msk.bf16.mxu0 %vm545_vm0, %v326_v7  ;;  %v403_v57 = vmul.f32 %v371_v53, %v371_v53  ;;  %v425_v60 = vpack.c.bf16 %v401_v55, %v400_v54  ;;  %v374_v0 = vunpack.c.l.bf16 %v342_v59  ;;  %v375_v1 = vunpack.c.h.bf16 %v342_v59  ;;  %v346_v7 = vld [vmem:[%s2164_s29 + $0x60] sm:$0xff]   ;;  %v2233_v42 = vld [vmem:[%s2222_s12 + $0x18] sm:$0xff]   ;;  %s2824_s29 = scalar_lea.hbm %s2882_s5, %s1621_s17 }
  0x24   : > { %v404_v2 = vmul.f32 %v372_v61, %v372_v61  ;;  %v405_v3 = vmul.f32 %v373_v62, %v373_v62  ;;  %v376_v9 = vunpack.c.l.bf16 %v344_v6  ;;  %v377_v10 = vunpack.c.h.bf16 %v344_v6  ;;  %v2265_v62 = vld [vmem:[%s2222_s12 + $0x48] sm:$0xff]  }
  0x25   : > { %v426_v63 = vpack.c.bf16 %v403_v57, %v402_v56  ;;  %v406_v4 = vmul.f32 %v374_v0, %v374_v0  ;;  %v407_v5 = vmul.f32 %v375_v1, %v375_v1  ;;  %v379_v13 = vunpack.c.h.bf16 %v346_v7  ;;  %v2254_v57 = vld [vmem:[%s2222_s12 + $0x38] sm:$0xff]  }
  0x26   : > { %v427_v8 = vpack.c.bf16 %v405_v3, %v404_v2  ;;  %v408_v14 = vmul.f32 %v376_v9, %v376_v9  ;;  %v409_v15 = vmul.f32 %v377_v10, %v377_v10  ;;  %v380_v21 = vunpack.c.l.bf16 %v348_v18  ;;  %v2280_v9 = vld [vmem:[%s2222_s12 + $0x58] sm:$0xff]   ;;  %v2283_v10 = vld [vmem:[%s2222_s12 + $0x50] sm:$0xff]  }
  0x27   : > { %v428_v11 = vpack.c.bf16 %v407_v5, %v406_v4  ;;  %v411_v17 = vmul.f32 %v379_v13, %v379_v13  ;;  %v381_v22 = vunpack.c.h.bf16 %v348_v18  ;;  %v382_v24 = vunpack.c.l.bf16 %v350_v19 }
  0x28   : > { %v383_v25 = vunpack.c.h.bf16 %v350_v19  ;;  %v412_v26 = vmul.f32 %v380_v21, %v380_v21  ;;  %v384_v32 = vunpack.c.l.bf16 %v352_v30  ;;  %v385_v33 = vunpack.c.h.bf16 %v352_v30 }
  0x29   : > { %1788 = vmatmul.mubr.msk.bf16.gmra.mxu1 %vm545_vm0, %v421_v36  ;;  %v413_v27 = vmul.f32 %v381_v22, %v381_v22  ;;  %v414_v28 = vmul.f32 %v382_v24, %v382_v24  ;;  %v1625_v54 = vunpack.c.h.bf16 %v2228_v40  ;;  %v1636_v55 = vunpack.c.l.bf16 %v2233_v42 }
  0x2a   : > { %1791 = vmatprep.mubr.msk.bf16.mxu1 %vm545_vm0, %v422_v39  ;;  %1750 = vmatmul.mubr.msk.bf16.gmra.mxu0 %vm545_vm0, %v328_v12  ;;  %v378_v12 = vunpack.c.l.bf16 %v346_v7  ;;  %v415_v29 = vmul.f32 %v383_v25, %v383_v25  ;;  %v417_v36 = vmul.f32 %v385_v33, %v385_v33  ;;  %v2225_v39 = vld [vmem:[%s2222_s12 + $0x8] sm:$0xff]   ;;  %v1632_v56 = vunpack.c.l.bf16 %v2236_v43 }
  0x2b   : > { %1753 = vmatprep.mubr.msk.bf16.mxu0 %vm545_vm0, %v330_v20  ;;  %v429_v20 = vpack.c.bf16 %v409_v15, %v408_v14  ;;  %v431_v31 = vpack.c.bf16 %v413_v27, %v412_v26  ;;  %v1629_v53 = vunpack.c.h.bf16 %v2225_v39  ;;  %v1633_v61 = vunpack.c.h.bf16 %v2236_v43 }
  0x2c   : > { %v410_v16 = vmul.f32 %v378_v12, %v378_v12  ;;  %v1644_v2 = vunpack.c.l.bf16 %v2244_v49  ;;  %v1640_v3 = vunpack.c.l.bf16 %v2247_v50  ;;  %v1645_v4 = vunpack.c.h.bf16 %v2244_v49 }
  0x2d   : > { %v1641_v5 = vunpack.c.h.bf16 %v2247_v50 }
  0x2e   : > { %v430_v23 = vpack.c.bf16 %v411_v17, %v410_v16  ;;  %v2290_v17 = vld [vmem:[%s2222_s12 + $0x68] sm:$0xff]  }
  0x31   : > { %1792 = vmatmul.mubr.msk.bf16.gmra.mxu1 %vm545_vm0, %v423_v48  ;;  %v1624_v48 = vunpack.c.l.bf16 %v2228_v40 }
  0x32   : > { %1795 = vmatprep.mubr.msk.bf16.mxu1 %vm545_vm0, %v424_v51  ;;  %1754 = vmatmul.mubr.msk.bf16.gmra.mxu0 %vm545_vm0, %v332_v34  ;;  %v432_v34 = vpack.c.bf16 %v415_v29, %v414_v28 }
  0x33   : > { %1757 = vmatprep.mubr.msk.bf16.mxu0 %vm545_vm0, %v334_v35  ;;  %v416_v35 = vmul.f32 %v384_v32, %v384_v32 }
  0x35   : > { %v433_v37 = vpack.c.bf16 %v417_v36, %v416_v35 }
  0x39   : > { %1796 = vmatmul.mubr.msk.bf16.gmra.mxu1 %vm545_vm0, %v425_v60  ;;  %v1637_v60 = vunpack.c.h.bf16 %v2233_v42 }
  0x3a   : > { %1799 = vmatprep.mubr.msk.bf16.mxu1 %vm545_vm0, %v426_v63  ;;  %1758 = vmatmul.mubr.msk.bf16.gmra.mxu0 %vm545_vm0, %v336_v46  ;;  %v2268_v63 = vld [vmem:[%s2222_s12 + $0x40] sm:$0xff]  }
  0x3b   : > { %1761 = vmatprep.mubr.msk.bf16.mxu0 %vm545_vm0, %v338_v47  ;;  %v1628_v47 = vunpack.c.l.bf16 %v2225_v39 }
  0x41   : > { %1800 = vmatmul.mubr.msk.bf16.gmra.mxu1 %vm545_vm0, %v427_v8 }
  0x42   : > { %1803 = vmatprep.mubr.msk.bf16.mxu1 %vm545_vm0, %v428_v11  ;;  %1762 = vmatmul.mubr.msk.bf16.gmra.mxu0 %vm545_vm0, %v340_v58  ;;  %v2257_v58 = vld [vmem:[%s2222_s12 + $0x30] sm:$0xff]  }
  0x43   : > { %1765 = vmatprep.mubr.msk.bf16.mxu0 %vm545_vm0, %v342_v59 }
  0x49   : > { %1804 = vmatmul.mubr.msk.bf16.gmra.mxu1 %vm545_vm0, %v429_v20  ;;  %v2301_v20 = vld [vmem:[%s2880_s3] ss:$0 sm:$0xff] }
  0x4a   : > { %1807 = vmatprep.mubr.msk.bf16.mxu1 %vm545_vm0, %v430_v23  ;;  %1766 = vmatmul.mubr.msk.bf16.gmra.mxu0 %vm545_vm0, %v344_v6 }
  0x4b   : > { %1769 = vmatprep.mubr.msk.bf16.mxu0 %vm545_vm0, %v346_v7 }
  0x51   : > { %1808 = vmatmul.mubr.msk.bf16.gmra.mxu1 %vm545_vm0, %v431_v31 }
  0x52   : > { %1811 = vmatprep.mubr.msk.bf16.mxu1 %vm545_vm0, %v432_v34  ;;  %1770 = vmatmul.mubr.msk.bf16.gmra.mxu0 %vm545_vm0, %v348_v18  ;;  %v2293_v18 = vld [vmem:[%s2222_s12 + $0x60] sm:$0xff]  }
  0x53   : > { %1773 = vmatprep.mubr.msk.bf16.mxu0 %vm545_vm0, %v350_v19 }
  0x59   : > { %1812 = vmatmul.mubr.msk.bf16.gmra.mxu1 %vm545_vm0, %v433_v37 }
  0x5a   : > { %1774 = vmatmul.mubr.msk.bf16.gmra.mxu0 %vm545_vm0, %v352_v30 }
  0xe1   : > { %v1785_v38 = vpop.f32.mrf.mxu1 }
  0xe2   : > { %v2230_v41 = vmax.f32 %v1785_v38, 1e-08  ;;  %v1747_v45 = vpop.f32.mrf.mxu0 }
  0xe3   : > { %v861_v44 = vpop.f32.mrf.mxu1  ;;  %v2315_v33 = vadd.f32 %v1747_v45, %v2301_v20 }
  0xe4   : > { %1910 = vrsqrt.f32 %v2230_v41  ;;  %v2239_v46 = vmax.f32 %v861_v44, 1e-08  ;;  %v628_v52 = vpop.f32.mrf.mxu0  ;;  %vm1036_vm1 = vcmp.eq.f32.partialorder %v2230_v41, inf  ;;  %vm1038_vm2 = vcmp.eq.f32.partialorder %v2230_v41, 0.0 }
  0xe5   : > { %v1786_v51 = vpop.f32.mrf.mxu1  ;;  %v1039_v37 = vand.u32 2147483648, %v2230_v41  ;;  %v2325_v38 = vadd.f32 %v2301_v20, %v628_v52 }
  0xe6   : > { %1912 = vrsqrt.f32 %v2239_v46  ;;  %v2260_v59 = vmax.f32 %v1786_v51, 1e-08  ;;  %v1748_v1 = vpop.f32.mrf.mxu0  ;;  %vm1022_vm3 = vcmp.eq.f32.partialorder %v2239_v46, inf  ;;  %vm1024_vm4 = vcmp.eq.f32.partialorder %v2239_v46, 0.0 }
  0xe7   : > { %v864_v0 = vpop.f32.mrf.mxu1  ;;  %v1025_v45 = vand.u32 2147483648, %v2239_v46  ;;  %v2331_v51 = vadd.f32 %v1748_v1, %v2301_v20 }
  0xe8   : > { %1914 = vrsqrt.f32 %v2260_v59  ;;  %v2275_v6 = vmax.f32 %v864_v0, 1e-08  ;;  %v631_v12 = vpop.f32.mrf.mxu0  ;;  %vm1043_vm5 = vcmp.eq.f32.partialorder %v2260_v59, inf  ;;  %vm1045_vm6 = vcmp.eq.f32.partialorder %v2260_v59, 0.0 }
  0xe9   : > { %v1789_v11 = vpop.f32.mrf.mxu1  ;;  %v2341_v35 = vadd.f32 %v2301_v20, %v631_v12 }
  0xea   : > { %1916 = vrsqrt.f32 %v2275_v6  ;;  %v2296_v19 = vmax.f32 %v1789_v11, 1e-08  ;;  %v1751_v24 = vpop.f32.mrf.mxu0  ;;  %vm1029_vm7 = vcmp.eq.f32.partialorder %v2275_v6, inf  ;;  %v1032_v1 = vand.u32 2147483648, %v2275_v6 }
  0xeb   : > { %v877_v23 = vpop.f32.mrf.mxu1  ;;  %vm1031_vm8 = vcmp.eq.f32.partialorder %v2275_v6, 0.0  ;;  %v2351_v28 = vadd.f32 %v1751_v24, %v2301_v20 }
  0xec   : > { %1918 = vrsqrt.f32 %v2296_v19  ;;  %v2310_v29 = vmax.f32 %v877_v23, 1e-08  ;;  %v644_v34 = vpop.f32.mrf.mxu0  ;;  %vm1064_vm9 = vcmp.eq.f32.partialorder %v2296_v19, inf  ;;  %v1067_v26 = vand.u32 2147483648, %v2296_v19 }
  0xed   : > { %v1790_v32 = vpop.f32.mrf.mxu1  ;;  %v2356_v25 = vadd.f32 %v2301_v20, %v644_v34  ;;  %vm1066_vm10 = vcmp.eq.f32.partialorder %v2296_v19, 0.0 }
  0xee   : > { %1920 = vrsqrt.f32 %v2310_v29  ;;  %v2321_v36 = vmax.f32 %v1790_v32, 1e-08  ;;  %v1752_v0 = vpop.f32.mrf.mxu0  ;;  %v1046_v32 = vand.u32 2147483648, %v2260_v59  ;;  %vm1050_vm11 = vcmp.eq.f32.partialorder %v2310_v29, inf }
  0xef   : > { %v880_v44 = vpop.f32.mrf.mxu1  ;;  %v2375_v14 = vadd.f32 %v1752_v0, %v2301_v20  ;;  %vm1052_vm12 = vcmp.eq.f32.partialorder %v2310_v29, 0.0 }
  0xf0   : > { %1922 = vrsqrt.f32 %v2321_v36  ;;  %v2334_v11 = vmax.f32 %v880_v44, 1e-08  ;;  %v647_v31 = vpop.f32.mrf.mxu0  ;;  %vm1071_vm13 = vcmp.eq.f32.partialorder %v2321_v36, inf  ;;  %vm1073_vm14 = vcmp.eq.f32.partialorder %v2321_v36, 0.0 }
  0xf1   : > { %v1911_v52 = vpop.eup %1910  ;;  %v1793_v23 = vpop.f32.mrf.mxu1 }
  0xf2   : > { %v1035_v44 = vmul.f32 %v1911_v52, %v2230_v41  ;;  %1924 = vrsqrt.f32 %v2334_v11  ;;  %v2347_v30 = vmax.f32 %v1793_v23, 1e-08  ;;  %v1053_v52 = vand.u32 2147483648, %v2310_v29  ;;  %v1755_v22 = vpop.f32.mrf.mxu0 }
  0xf3   : > { %v1913_v27 = vpop.eup %1912  ;;  %v893_v12 = vpop.f32.mrf.mxu1  ;;  %vm1057_vm15 = vcmp.eq.f32.partialorder %v2334_v11, inf  ;;  %vm1059_vm0 = vcmp.eq.f32.partialorder %v2334_v11, 0.0 }
  0xf4   : > { %v1037_v24 = vsel %vm1036_vm1, %v2230_v41, %v1035_v44  ;;  %v1021_v23 = vmul.f32 %v1913_v27, %v2239_v46  ;;  %1926 = vrsqrt.f32 %v2347_v30  ;;  %v2368_v21 = vmax.f32 %v893_v12, 1e-08  ;;  %v660_v13 = vpop.f32.mrf.mxu0 }
  0xf5   : > { %v1915_v34 = vpop.eup %1914  ;;  %v1040_v16 = vsel %vm1038_vm2, %v1039_v37, %v1037_v24  ;;  %v1794_v15 = vpop.f32.mrf.mxu1  ;;  %v1074_v44 = vand.u32 2147483648, %v2321_v36  ;;  %v2379_v27 = vadd.f32 %v2301_v20, %v647_v31  ;;  %vm1092_vm1 = vcmp.eq.f32.partialorder %v2347_v30, inf }
  0xf6   : > { %v1310_v12 = vmul.f32 %v1628_v47, %v1040_v16  ;;  %v1023_v41 = vsel %vm1022_vm3, %v2239_v46, %v1021_v23  ;;  %v1042_v37 = vmul.f32 %v1915_v34, %v2260_v59  ;;  %1928 = vrsqrt.f32 %v2368_v21  ;;  %v2398_v23 = vpop.f32.mrf.mxu0 }
  0xf7   : > { %v1917_v0 = vpop.eup %1916  ;;  %v1026_v24 = vsel %vm1024_vm4, %v1025_v45, %v1023_v41  ;;  %v2391_v31 = vmax.f32 %v1794_v15, 1e-08  ;;  %v896_v8 = vpop.f32.mrf.mxu1  ;;  %v1060_v47 = vand.u32 2147483648, %v2334_v11  ;;  %v2396_v16 = vadd.f32 %v1755_v22, %v2301_v20 }
  0xf8   : > { %v1342_v34 = vadd.f32 %v1310_v12, %v2315_v33  ;;  %v1308_v7 = vmul.f32 %v1624_v48, %v1026_v24  ;;  %v1044_v46 = vsel %vm1043_vm5, %v2260_v59, %v1042_v37  ;;  %v1028_v15 = vmul.f32 %v1917_v0, %v2275_v6  ;;  %v2415_v12 = vpop.f32.mrf.mxu0 }
  0xf9   : > { %v1919_v45 = vpop.eup %1918  ;;  %v1047_v22 = vsel %vm1045_vm6, %v1046_v32, %v1044_v46  ;;  %1930 = vrsqrt.f32 %v2391_v31  ;;  %v2411_v41 = vmax.f32 %v896_v8, 1e-08  ;;  %v1797_v33 = vpop.f32.mrf.mxu1  ;;  %v1095_v48 = vand.u32 2147483648, %v2347_v30 }
  0xfa   : > { %1374 = vst [vmem:[%s2418_s16 + $0x10] sm:$0xff] %v1342_v34  ;;  %v1340_v37 = vadd.f32 %v1308_v7, %v2325_v38  ;;  %v1311_v59 = vmul.f32 %v1629_v53, %v1047_v22  ;;  %v1030_v8 = vsel %vm1029_vm7, %v2275_v6, %v1028_v15  ;;  %v1063_v32 = vmul.f32 %v1919_v45, %v2296_v19  ;;  %v2440_v38 = vpop.f32.mrf.mxu0 }
  0xfb   : > { %v1921_v0 = vpop.eup %1920  ;;  %v1033_v24 = vsel %vm1031_vm8, %v1032_v1, %v1030_v8  ;;  %1932 = vrsqrt.f32 %v2411_v41  ;;  %v2434_v7 = vmax.f32 %v1797_v33, 1e-08  ;;  %v909_v39 = vpop.f32.mrf.mxu1  ;;  %v2438_v53 = vadd.f32 %v2301_v20, %v660_v13 }
  0xfc   : > { %1372 = vst [vmem:[%s2418_s16] sm:$0xff] %v1340_v37  ;;  %v1343_v34 = vadd.f32 %v1311_v59, %v2331_v51  ;;  %v1309_v6 = vmul.f32 %v1625_v54, %v1033_v24  ;;  %v1065_v1 = vsel %vm1064_vm9, %v2296_v19, %v1063_v32  ;;  %v1049_v46 = vmul.f32 %v1921_v0, %v2310_v29  ;;  %v2459_v54 = vpop.f32.mrf.mxu0 }
  0xfd   : > { %vm1094_vm2 = vcmp.eq.f32.partialorder %v2347_v30, 0.0  ;;  %v1923_v15 = vpop.eup %1922  ;;  %v1068_v13 = vsel %vm1066_vm10, %v1067_v26, %v1065_v1  ;;  %1934 = vrsqrt.f32 %v2434_v7  ;;  %v2456_v51 = vmax.f32 %v909_v39, 1e-08  ;;  %v1798_v40 = vpop.f32.mrf.mxu1 }
  0xfe   : > { %vm1078_vm3 = vcmp.eq.f32.partialorder %v2368_v21, inf  ;;  %1375 = vst [vmem:[%s2418_s16 + $0x18] sm:$0xff] %v1343_v34  ;;  %v1341_v45 = vadd.f32 %v1309_v6, %v2341_v35  ;;  %v1314_v22 = vmul.f32 %v1636_v55, %v1068_v13  ;;  %v1051_v19 = vsel %vm1050_vm11, %v2310_v29, %v1049_v46  ;;  %v2478_v8 = vpop.f32.mrf.mxu0 }
  0xff   : > { %v1070_v26 = vmul.f32 %v1923_v15, %v2321_v36  ;;  %vm1080_vm4 = vcmp.eq.f32.partialorder %v2368_v21, 0.0  ;;  %v1925_v33 = vpop.eup %1924  ;;  %v1054_v37 = vsel %vm1052_vm12, %v1053_v52, %v1051_v19  ;;  %1936 = vrsqrt.f32 %v2456_v51  ;;  %v912_v55 = vpop.f32.mrf.mxu1 }
 0x100   : > { %v2475_v35 = vmax.f32 %v1798_v40, 1e-08  ;;  %v1081_v59 = vand.u32 2147483648, %v2368_v21  ;;  %1373 = vst [vmem:[%s2418_s16 + $0x8] sm:$0xff] %v1341_v45  ;;  %v1346_v32 = vadd.f32 %v1314_v22, %v2351_v28  ;;  %v1312_v0 = vmul.f32 %v1632_v56, %v1054_v37  ;;  %v2499_v6 = vpop.f32.mrf.mxu0 }
 0x101   : > { %v1072_v29 = vsel %vm1071_vm13, %v2321_v36, %v1070_v26  ;;  %v1056_v52 = vmul.f32 %v1925_v33, %v2334_v11  ;;  %v1927_v24 = vpop.eup %1926  ;;  %v2493_v34 = vmax.f32 %v912_v55, 1e-08  ;;  %v1801_v28 = vpop.f32.mrf.mxu1  ;;  %v2497_v56 = vadd.f32 %v2398_v23, %v2301_v20 }
 0x102   : > { %v1075_v39 = vsel %vm1073_vm14, %v1074_v44, %v1072_v29  ;;  %1938 = vrsqrt.f32 %v2475_v35  ;;  %1378 = vst [vmem:[%s2418_s16 + $0x30] sm:$0xff] %v1346_v32  ;;  %v1344_v1 = vadd.f32 %v1312_v0, %v2356_v25  ;;  %v1091_v44 = vmul.f32 %v1927_v24, %v2347_v30 }
 0x103   : > { %v1315_v46 = vmul.f32 %v1637_v60, %v1075_v39  ;;  %v1058_v36 = vsel %vm1057_vm15, %v2334_v11, %v1056_v52  ;;  %v1929_v15 = vpop.eup %1928  ;;  %1940 = vrsqrt.f32 %v2493_v34  ;;  %v2514_v13 = vmax.f32 %v1801_v28, 1e-08  ;;  %v925_v42 = vpop.f32.mrf.mxu1 }
 0x104   : > { %v1061_v23 = vsel %vm1059_vm0, %v1060_v47, %v1058_v36  ;;  %vm1099_vm5 = vcmp.eq.f32.partialorder %v2391_v31, inf  ;;  %v2517_v60 = vpop.f32.mrf.mxu0  ;;  %1376 = vst [vmem:[%s2418_s16 + $0x20] sm:$0xff] %v1344_v1  ;;  %v1093_v11 = vsel %vm1092_vm1, %v2347_v30, %v1091_v44  ;;  %v1077_v47 = vmul.f32 %v1929_v15, %v2368_v21 }
 0x105   : > { %v1347_v25 = vadd.f32 %v1315_v46, %v2375_v14  ;;  %v1313_v40 = vmul.f32 %v1633_v61, %v1061_v23  ;;  %v1096_v45 = vsel %vm1094_vm2, %v1095_v48, %v1093_v11  ;;  %1942 = vrsqrt.f32 %v2514_v13  ;;  %v1802_v43 = vpop.f32.mrf.mxu1 }
 0x106   : > { %vm1101_vm6 = vcmp.eq.f32.partialorder %v2391_v31, 0.0  ;;  %v2533_v14 = vmax.f32 %v925_v42, 1e-08  ;;  %v1931_v61 = vpop.eup %1930  ;;  %v1318_v19 = vmul.f32 %v1644_v2, %v1096_v45  ;;  %v1079_v30 = vsel %vm1078_vm3, %v2368_v21, %v1077_v47  ;;  %v2543_v26 = vpop.f32.mrf.mxu0 }
 0x107   : > { %1379 = vst [vmem:[%s2418_s16 + $0x38] sm:$0xff] %v1347_v25  ;;  %v1345_v22 = vadd.f32 %v1313_v40, %v2379_v27  ;;  %v1102_v48 = vand.u32 2147483648, %v2391_v31  ;;  %v1082_v33 = vsel %vm1080_vm4, %v1081_v59, %v1079_v30  ;;  %v1098_v37 = vmul.f32 %v1931_v61, %v2391_v31  ;;  %v928_v2 = vpop.f32.mrf.mxu1 }
 0x108   : > { %1944 = vrsqrt.f32 %v2533_v14  ;;  %v664_v27 = vadd.f32 %v2301_v20, %v2415_v12  ;;  %v1933_v55 = vpop.eup %1932  ;;  %v1350_v32 = vadd.f32 %v1318_v19, %v2396_v16  ;;  %v1316_v0 = vmul.f32 %v1640_v3, %v1082_v33  ;;  %v2571_v28 = vpop.f32.mrf.mxu0 }
 0x109   : > { %1377 = vst [vmem:[%s2418_s16 + $0x28] sm:$0xff] %v1345_v22  ;;  %vm1085_vm7 = vcmp.eq.f32.partialorder %v2411_v41, inf  ;;  %vm1087_vm8 = vcmp.eq.f32.partialorder %v2411_v41, 0.0  ;;  %v1100_v21 = vsel %vm1099_vm5, %v2391_v31, %v1098_v37  ;;  %v1084_v59 = vmul.f32 %v1933_v55, %v2411_v41  ;;  %v1805_v52 = vpop.f32.mrf.mxu1 }
 0x10a   : > { %v1088_v12 = vand.u32 2147483648, %v2411_v41  ;;  %v2562_v29 = vmax.f32 %v1802_v43, 1e-08  ;;  %v1935_v16 = vpop.eup %1934  ;;  %1382 = vst [vmem:[%s2418_s16 + $0x50] sm:$0xff] %v1350_v32  ;;  %v1348_v3 = vadd.f32 %v1316_v0, %v2438_v53  ;;  %v1103_v24 = vsel %vm1101_vm6, %v1102_v48, %v1100_v21  ;;  %v2594_v47 = vpop.f32.mrf.mxu0 }
 0x10b   : > { %v685_v39 = vadd.f32 %v2440_v38, %v2301_v20  ;;  %vm1120_vm9 = vcmp.eq.f32.partialorder %v2434_v7, inf  ;;  %v1319_v1 = vmul.f32 %v1645_v4, %v1103_v24  ;;  %v1086_v46 = vsel %vm1085_vm7, %v2411_v41, %v1084_v59  ;;  %v941_v53 = vpop.f32.mrf.mxu1 }
 0x10c   : > { %1946 = vrsqrt.f32 %v2562_v29  ;;  %v1119_v36 = vmul.f32 %v1935_v16, %v2434_v7  ;;  %v1937_v44 = vpop.eup %1936  ;;  %1380 = vst [vmem:[%s2418_s16 + $0x40] sm:$0xff] %v1348_v3  ;;  %v1089_v31 = vsel %vm1087_vm8, %v1088_v12, %v1086_v46  ;;  %vm1122_vm10 = vcmp.eq.f32.partialorder %v2434_v7, 0.0  ;;  %v2615_v32 = vpop.f32.mrf.mxu0 }
 0x10d   : > { %v1123_v38 = vand.u32 2147483648, %v2434_v7  ;;  %v2583_v15 = vmax.f32 %v928_v2, 1e-08  ;;  %v1351_v49 = vadd.f32 %v1319_v1, %v2497_v56  ;;  %v1317_v4 = vmul.f32 %v1641_v5, %v1089_v31  ;;  %v1806_v25 = vpop.f32.mrf.mxu1 }
 0x10e   : > { %v1121_v23 = vsel %vm1120_vm9, %v2434_v7, %v1119_v36  ;;  %v1105_v42 = vmul.f32 %v1937_v44, %v2456_v51  ;;  %v677_v11 = vadd.f32 %v2301_v20, %v2459_v54  ;;  %vm1106_vm11 = vcmp.eq.f32.partialorder %v2456_v51, inf }
 0x10f   : > { %v1939_v40 = vpop.eup %1938  ;;  %v1124_v41 = vsel %vm1122_vm10, %v1123_v38, %v1121_v23  ;;  %1948 = vrsqrt.f32 %v2583_v15  ;;  %1383 = vst [vmem:[%s2418_s16 + $0x58] sm:$0xff] %v1351_v49  ;;  %v1349_v50 = vadd.f32 %v1317_v4, %v664_v27  ;;  %v2885_v5 = vunpack.c.l.bf16 %v2254_v57  ;;  %v944_v43 = vpop.f32.mrf.mxu1 }
 0x110   : > { %v1107_v56 = vsel %vm1106_vm11, %v2456_v51, %v1105_v42  ;;  %v1109_v45 = vand.u32 2147483648, %v2456_v51  ;;  %v1941_v61 = vpop.eup %1940  ;;  %vm1108_vm12 = vcmp.eq.f32.partialorder %v2456_v51, 0.0  ;;  %v2602_v22 = vmax.f32 %v1805_v52, 1e-08 }
 0x111   : > { %v1322_v7 = vmul.f32 %v2885_v5, %v1124_v41  ;;  %v1126_v54 = vmul.f32 %v1939_v40, %v2475_v35  ;;  %vm1127_vm13 = vcmp.eq.f32.partialorder %v2475_v35, inf  ;;  %1381 = vst [vmem:[%s2418_s16 + $0x48] sm:$0xff] %v1349_v50  ;;  %vm1129_vm14 = vcmp.eq.f32.partialorder %v2475_v35, 0.0  ;;  %v1809_v33 = vpop.f32.mrf.mxu1 }
 0x112   : > { %v1110_v30 = vsel %vm1108_vm12, %v1109_v45, %v1107_v56  ;;  %v1130_v48 = vand.u32 2147483648, %v2475_v35  ;;  %v1943_v37 = vpop.eup %1942  ;;  %v2886_v27 = vunpack.c.l.bf16 %v2257_v58  ;;  %1950 = vrsqrt.f32 %v2602_v22 }
 0x113   : > { %v1354_v19 = vadd.f32 %v1322_v7, %v685_v39  ;;  %v1128_v51 = vsel %vm1127_vm13, %v2475_v35, %v1126_v54  ;;  %v2613_v55 = vmax.f32 %v941_v53, 1e-08  ;;  %v688_v0 = vadd.f32 %v2478_v8, %v2301_v20  ;;  %v957_v52 = vpop.f32.mrf.mxu1  ;;  %v2637_v53 = vpop.f32.mrf.mxu0 }
 0x114   : > { %v1320_v2 = vmul.f32 %v2886_v27, %v1110_v30  ;;  %v1131_v21 = vsel %vm1129_vm14, %v1130_v48, %v1128_v51  ;;  %v680_v59 = vadd.f32 %v2301_v20, %v2499_v6  ;;  %v1112_v12 = vmul.f32 %v1941_v61, %v2493_v34 }
 0x115   : > { %1386 = vst [vmem:[%s2418_s16 + $0x70] sm:$0xff] %v1354_v19  ;;  %v1945_v16 = vpop.eup %1944  ;;  %v2887_v35 = vunpack.c.h.bf16 %v2254_v57  ;;  %1952 = vrsqrt.f32 %v2613_v55  ;;  %vm1113_vm15 = vcmp.eq.f32.partialorder %v2493_v34, inf  ;;  %vm1115_vm0 = vcmp.eq.f32.partialorder %v2493_v34, 0.0  ;;  %v1810_v36 = vpop.f32.mrf.mxu1 }
 0x116   : > { %v1352_v3 = vadd.f32 %v1320_v2, %v677_v11  ;;  %v1114_v39 = vsel %vm1113_vm15, %v2493_v34, %v1112_v12  ;;  %v1116_v8 = vand.u32 2147483648, %v2493_v34  ;;  %v2630_v6 = vmax.f32 %v1806_v25, 1e-08  ;;  %v2657_v5 = vpop.f32.mrf.mxu0 }
 0x117   : > { %v1323_v24 = vmul.f32 %v2887_v35, %v1131_v21  ;;  %v701_v46 = vadd.f32 %v2517_v60, %v2301_v20  ;;  %v1147_v57 = vmul.f32 %v1943_v37, %v2514_v13  ;;  %vm1148_vm1 = vcmp.eq.f32.partialorder %v2514_v13, inf }
 0x118   : > { %1384 = vst [vmem:[%s2418_s16 + $0x60] sm:$0xff] %v1352_v3  ;;  %v1117_v44 = vsel %vm1115_vm0, %v1116_v8, %v1114_v39  ;;  %1954 = vrsqrt.f32 %v2630_v6  ;;  %v1151_v31 = vand.u32 2147483648, %v2514_v13  ;;  %v2641_v34 = vmax.f32 %v944_v43, 1e-08  ;;  %v711_v51 = vpop.f32.mrf.mxu0 }
 0x119   : > { %v1355_v1 = vadd.f32 %v1323_v24, %v688_v0  ;;  %v1947_v38 = vpop.eup %1946  ;;  %v2888_v49 = vunpack.c.h.bf16 %v2257_v58  ;;  %v1149_v60 = vsel %vm1148_vm1, %v2514_v13, %v1147_v57  ;;  %vm1150_vm2 = vcmp.eq.f32.partialorder %v2514_v13, 0.0  ;;  %v960_v13 = vpop.f32.mrf.mxu1 }
 0x11a   : > { %v1133_v23 = vmul.f32 %v1945_v16, %v2533_v14  ;;  %v1152_v42 = vsel %vm1150_vm2, %v1151_v31, %v1149_v60  ;;  %1956 = vrsqrt.f32 %v2641_v34  ;;  %v693_v25 = vadd.f32 %v2301_v20, %v2543_v26  ;;  %v1771_v8 = vpop.f32.mrf.mxu0 }
 0x11b   : > { %1387 = vst [vmem:[%s2418_s16 + $0x78] sm:$0xff] %v1355_v1  ;;  %v1321_v4 = vmul.f32 %v2888_v49, %v1117_v44  ;;  %vm1134_vm3 = vcmp.eq.f32.partialorder %v2533_v14, inf  ;;  %v2889_v41 = vunpack.c.l.bf16 %v2265_v62  ;;  %v1137_v50 = vand.u32 2147483648, %v2533_v14  ;;  %v1813_v2 = vpop.f32.mrf.mxu1 }
 0x11c   : > { %v1135_v11 = vsel %vm1134_vm3, %v2533_v14, %v1133_v23  ;;  %v1949_v7 = vpop.eup %1948  ;;  %vm1136_vm4 = vcmp.eq.f32.partialorder %v2533_v14, 0.0  ;;  %v2660_v56 = vmax.f32 %v1809_v33, 1e-08  ;;  %v1154_v26 = vmul.f32 %v1947_v38, %v2562_v29 }
 0x11d   : > { %v1353_v40 = vadd.f32 %v1321_v4, %v680_v59  ;;  %v1326_v58 = vmul.f32 %v2889_v41, %v1152_v42  ;;  %vm1155_vm5 = vcmp.eq.f32.partialorder %v2562_v29, inf  ;;  %v1138_v43 = vsel %vm1136_vm4, %v1137_v50, %v1135_v11 }
 0x11e   : > { %vm1157_vm6 = vcmp.eq.f32.partialorder %v2562_v29, 0.0  ;;  %v1158_v61 = vand.u32 2147483648, %v2562_v29  ;;  %v2890_v54 = vunpack.c.l.bf16 %v2268_v63  ;;  %1958 = vrsqrt.f32 %v2660_v56 }
 0x11f   : > { %1385 = vst [vmem:[%s2418_s16 + $0x68] sm:$0xff] %v1353_v40  ;;  %v1358_v45 = vadd.f32 %v1326_v58, %v701_v46  ;;  %v1156_v14 = vsel %vm1155_vm5, %v2562_v29, %v1154_v26  ;;  %v2671_v30 = vmax.f32 %v957_v52, 1e-08  ;;  %v704_v48 = vadd.f32 %v2571_v28, %v2301_v20  ;;  %v1951_v0 = vpop.eup %1950 }
 0x120   : > { %v1324_v19 = vmul.f32 %v2890_v54, %v1138_v43  ;;  %v1159_v33 = vsel %vm1157_vm6, %v1158_v61, %v1156_v14  ;;  %v696_v37 = vadd.f32 %v2301_v20, %v2594_v47  ;;  %v1140_v27 = vmul.f32 %v1949_v7, %v2583_v15 }
 0x121   : > { %1390 = vst [vmem:[%s2418_s16 + $0x90] sm:$0xff] %v1358_v45  ;;  %v2891_v59 = vunpack.c.h.bf16 %v2265_v62  ;;  %1960 = vrsqrt.f32 %v2671_v30  ;;  %vm1141_vm7 = vcmp.eq.f32.partialorder %v2583_v15, inf  ;;  %vm1143_vm8 = vcmp.eq.f32.partialorder %v2583_v15, 0.0 }
 0x122   : > { %v1356_v21 = vadd.f32 %v1324_v19, %v693_v25  ;;  %v1142_v28 = vsel %vm1141_vm7, %v2583_v15, %v1140_v27  ;;  %v1144_v47 = vand.u32 2147483648, %v2583_v15  ;;  %v2686_v12 = vmax.f32 %v1810_v36, 1e-08  ;;  %v1953_v52 = vpop.eup %1952  ;;  %v973_v15 = vpop.f32.mrf.mxu1 }
 0x123   : > { %v1327_v29 = vmul.f32 %v2891_v59, %v1159_v33  ;;  %v717_v62 = vadd.f32 %v2615_v32, %v2301_v20  ;;  %v1175_v3 = vmul.f32 %v1951_v0, %v2602_v22  ;;  %vm1176_vm9 = vcmp.eq.f32.partialorder %v2602_v22, inf  ;;  %v724_v25 = vpop.f32.mrf.mxu0 }
 0x124   : > { %1388 = vst [vmem:[%s2418_s16 + $0x80] sm:$0xff] %v1356_v21  ;;  %v1145_v35 = vsel %vm1143_vm8, %v1144_v47, %v1142_v28  ;;  %1962 = vrsqrt.f32 %v2686_v12  ;;  %v1179_v24 = vand.u32 2147483648, %v2602_v22  ;;  %v2695_v39 = vmax.f32 %v960_v13, 1e-08 }
 0x125   : > { %v1359_v16 = vadd.f32 %v1327_v29, %v704_v48  ;;  %v2892_v1 = vunpack.c.h.bf16 %v2268_v63  ;;  %v1177_v57 = vsel %vm1176_vm9, %v2602_v22, %v1175_v3  ;;  %vm1178_vm10 = vcmp.eq.f32.partialorder %v2602_v22, 0.0  ;;  %v1955_v36 = vpop.eup %1954  ;;  %v1772_v48 = vpop.f32.mrf.mxu0 }
 0x126   : > { %v1161_v32 = vmul.f32 %v1953_v52, %v2613_v55  ;;  %v1180_v44 = vsel %vm1178_vm10, %v1179_v24, %v1177_v57  ;;  %1964 = vrsqrt.f32 %v2695_v39  ;;  %v709_v31 = vadd.f32 %v2301_v20, %v2637_v53  ;;  %v1814_v53 = vpop.f32.mrf.mxu1 }
 0x127   : > { %1391 = vst [vmem:[%s2418_s16 + $0x98] sm:$0xff] %v1359_v16  ;;  %v1325_v46 = vmul.f32 %v2892_v1, %v1145_v35  ;;  %vm1162_vm11 = vcmp.eq.f32.partialorder %v2613_v55, inf  ;;  %v2893_v63 = vunpack.c.l.bf16 %v2280_v9  ;;  %v1165_v22 = vand.u32 2147483648, %v2613_v55  ;;  %v1957_v60 = vpop.eup %1956  ;;  %v727_v52 = vpop.f32.mrf.mxu0  ;;  %v2754_v16 = vld [vmem:[%s2222_s12 + $0x78] sm:$0xff]  }
 0x128   : > { %v1163_v4 = vsel %vm1162_vm11, %v2613_v55, %v1161_v32  ;;  %vm1164_vm12 = vcmp.eq.f32.partialorder %v2613_v55, 0.0  ;;  %v2712_v23 = vmax.f32 %v1813_v2, 1e-08  ;;  %v1182_v42 = vmul.f32 %v1955_v36, %v2630_v6 }
 0x129   : > { %v1357_v38 = vadd.f32 %v1325_v46, %v696_v37  ;;  %v1330_v49 = vmul.f32 %v2893_v63, %v1180_v44  ;;  %vm1183_vm13 = vcmp.eq.f32.partialorder %v2630_v6, inf  ;;  %v1166_v41 = vsel %vm1164_vm12, %v1165_v22, %v1163_v4  ;;  %v2776_v22 = vld [vmem:[%s2222_s12 + $0x70] sm:$0xff]  }
 0x12a   : > { %vm1185_vm14 = vcmp.eq.f32.partialorder %v2630_v6, 0.0  ;;  %v1186_v58 = vand.u32 2147483648, %v2630_v6  ;;  %v2894_v11 = vunpack.c.l.bf16 %v2283_v10  ;;  %1966 = vrsqrt.f32 %v2712_v23 }
 0x12b   : > { %1389 = vst [vmem:[%s2418_s16 + $0x88] sm:$0xff] %v1357_v38  ;;  %v1362_v40 = vadd.f32 %v1330_v49, %v717_v62  ;;  %v1184_v55 = vsel %vm1183_vm13, %v2630_v6, %v1182_v42  ;;  %v2723_v13 = vmax.f32 %v973_v15, 1e-08  ;;  %v720_v7 = vadd.f32 %v2657_v5, %v2301_v20  ;;  %v1959_v61 = vpop.eup %1958  ;;  %v976_v6 = vpop.f32.mrf.mxu1 }
 0x12c   : > { %v1328_v50 = vmul.f32 %v2894_v11, %v1166_v41  ;;  %v1187_v26 = vsel %vm1185_vm14, %v1186_v58, %v1184_v55  ;;  %v712_v45 = vadd.f32 %v2301_v20, %v711_v51  ;;  %v1168_v43 = vmul.f32 %v1957_v60, %v2641_v34  ;;  %v1775_v38 = vpop.f32.mrf.mxu0 }
 0x12d   : > { %1394 = vst [vmem:[%s2418_s16 + $0xb0] sm:$0xff] %v1362_v40  ;;  %v2895_v19 = vunpack.c.h.bf16 %v2280_v9  ;;  %1968 = vrsqrt.f32 %v2723_v13  ;;  %vm1169_vm15 = vcmp.eq.f32.partialorder %v2641_v34, inf  ;;  %vm1171_vm0 = vcmp.eq.f32.partialorder %v2641_v34, 0.0 }
 0x12e   : > { %v1360_v54 = vadd.f32 %v1328_v50, %v709_v31  ;;  %v1170_v5 = vsel %vm1169_vm15, %v2641_v34, %v1168_v43  ;;  %v1172_v33 = vand.u32 2147483648, %v2641_v34  ;;  %v2737_v37 = vmax.f32 %v1814_v53, 1e-08  ;;  %v1961_v27 = vpop.eup %1960  ;;  %v740_v55 = vpop.f32.mrf.mxu0 }
 0x12f   : > { %v1331_v14 = vmul.f32 %v2895_v19, %v1187_v26  ;;  %v733_v2 = vadd.f32 %v1771_v8, %v2301_v20  ;;  %v1203_v51 = vmul.f32 %v1959_v61, %v2660_v56  ;;  %vm1204_vm1 = vcmp.eq.f32.partialorder %v2660_v56, inf }
 0x130   : > { %1392 = vst [vmem:[%s2418_s16 + $0xa0] sm:$0xff] %v1360_v54  ;;  %v1173_v0 = vsel %vm1171_vm0, %v1172_v33, %v1170_v5  ;;  %1970 = vrsqrt.f32 %v2737_v37  ;;  %v1207_v21 = vand.u32 2147483648, %v2660_v56  ;;  %v2745_v59 = vmax.f32 %v976_v6, 1e-08 }
 0x131   : > { %v1363_v9 = vadd.f32 %v1331_v14, %v720_v7  ;;  %v2896_v34 = vunpack.c.h.bf16 %v2283_v10  ;;  %v1205_v28 = vsel %vm1204_vm1, %v2660_v56, %v1203_v51  ;;  %vm1206_vm2 = vcmp.eq.f32.partialorder %v2660_v56, 0.0  ;;  %v1963_v62 = vpop.eup %1962 }
 0x132   : > { %v1189_v47 = vmul.f32 %v1961_v27, %v2671_v30  ;;  %v1208_v3 = vsel %vm1206_vm2, %v1207_v21, %v1205_v28  ;;  %1972 = vrsqrt.f32 %v2745_v59  ;;  %vm1190_vm3 = vcmp.eq.f32.partialorder %v2671_v30, inf  ;;  %v1776_v27 = vpop.f32.mrf.mxu0 }
 0x133   : > { %1395 = vst [vmem:[%s2418_s16 + $0xb8] sm:$0xff] %v1363_v9  ;;  %v1329_v29 = vmul.f32 %v2896_v34, %v1173_v0  ;;  %v1673_v35 = vunpack.c.h.bf16 %v2293_v18  ;;  %v2897_v24 = vunpack.c.l.bf16 %v2290_v17  ;;  %v1193_v8 = vand.u32 2147483648, %v2671_v30  ;;  %v1965_v1 = vpop.eup %1964 }
 0x134   : > { %v1191_v56 = vsel %vm1190_vm3, %v2671_v30, %v1189_v47  ;;  %v725_v46 = vadd.f32 %v2301_v20, %v724_v25  ;;  %vm1192_vm4 = vcmp.eq.f32.partialorder %v2671_v30, 0.0  ;;  %v1210_v57 = vmul.f32 %v1963_v62, %v2686_v12  ;;  %v743_v62 = vpop.f32.mrf.mxu0 }
 0x135   : > { %v1361_v10 = vadd.f32 %v1329_v29, %v712_v45  ;;  %v1334_v15 = vmul.f32 %v2897_v24, %v1208_v3  ;;  %v1684_v32 = vunpack.c.l.bf16 %v2754_v16  ;;  %v1194_v44 = vsel %vm1192_vm4, %v1193_v8, %v1191_v56 }
 0x136   : > { %vm1211_vm5 = vcmp.eq.f32.partialorder %v2686_v12, inf  ;;  %v1214_v31 = vand.u32 2147483648, %v2686_v12  ;;  %v2898_v63 = vunpack.c.l.bf16 %v2293_v18  ;;  %vm1213_vm6 = vcmp.eq.f32.partialorder %v2686_v12, 0.0 }
 0x137   : > { %1393 = vst [vmem:[%s2418_s16 + $0xa8] sm:$0xff] %v1361_v10  ;;  %v1366_v36 = vadd.f32 %v1334_v15, %v733_v2  ;;  %v1212_v4 = vsel %vm1211_vm5, %v2686_v12, %v1210_v57  ;;  %v1196_v30 = vmul.f32 %v1965_v1, %v2695_v39  ;;  %v736_v60 = vadd.f32 %v1772_v48, %v2301_v20  ;;  %v1967_v25 = vpop.eup %1966 }
 0x138   : > { %v1332_v49 = vmul.f32 %v2898_v63, %v1194_v44  ;;  %v1215_v42 = vsel %vm1213_vm6, %v1214_v31, %v1212_v4  ;;  %vm1197_vm7 = vcmp.eq.f32.partialorder %v2695_v39, inf  ;;  %v1200_v53 = vand.u32 2147483648, %v2695_v39 }
 0x139   : > { %1398 = vst [vmem:[%s2418_s16 + $0xd0] sm:$0xff] %v1366_v36  ;;  %v2899_v40 = vunpack.c.h.bf16 %v2290_v17  ;;  %v1198_v12 = vsel %vm1197_vm7, %v2695_v39, %v1196_v30  ;;  %vm1199_vm8 = vcmp.eq.f32.partialorder %v2695_v39, 0.0  ;;  %v728_v58 = vadd.f32 %v2301_v20, %v727_v52 }
 0x13a   : > { %v1364_v18 = vadd.f32 %v1332_v49, %v725_v46  ;;  %v1201_v11 = vsel %vm1199_vm8, %v1200_v53, %v1198_v12  ;;  %v1231_v50 = vmul.f32 %v1967_v25, %v2712_v23  ;;  %v1680_v7 = vunpack.c.l.bf16 %v2776_v22  ;;  %v1969_v26 = vpop.eup %1968 }
 0x13b   : > { %v1335_v41 = vmul.f32 %v2899_v40, %v1215_v42  ;;  %v1333_v43 = vmul.f32 %v1673_v35, %v1201_v11  ;;  %vm1232_vm9 = vcmp.eq.f32.partialorder %v2712_v23, inf  ;;  %v1235_v17 = vand.u32 2147483648, %v2712_v23 }
 0x13c   : > { %1396 = vst [vmem:[%s2418_s16 + $0xc0] sm:$0xff] %v1364_v18  ;;  %v749_v39 = vadd.f32 %v1775_v38, %v2301_v20  ;;  %v1233_v61 = vsel %vm1232_vm9, %v2712_v23, %v1231_v50  ;;  %vm1234_vm10 = vcmp.eq.f32.partialorder %v2712_v23, 0.0  ;;  %v1217_v54 = vmul.f32 %v1969_v26, %v2723_v13 }
 0x13d   : > { %v1367_v45 = vadd.f32 %v1335_v41, %v736_v60  ;;  %v1365_v19 = vadd.f32 %v1333_v43, %v728_v58  ;;  %v1236_v14 = vsel %vm1234_vm10, %v1235_v17, %v1233_v61  ;;  %vm1218_vm11 = vcmp.eq.f32.partialorder %v2723_v13, inf  ;;  %v1971_v48 = vpop.eup %1970 }
 0x13e   : > { %v1221_v6 = vand.u32 2147483648, %v2723_v13  ;;  %v1338_v5 = vmul.f32 %v1684_v32, %v1236_v14  ;;  %v1219_v33 = vsel %vm1218_vm11, %v2723_v13, %v1217_v54  ;;  %vm1220_vm12 = vcmp.eq.f32.partialorder %v2723_v13, 0.0 }
 0x13f   : > { %1399 = vst [vmem:[%s2418_s16 + $0xd8] sm:$0xff] %v1367_v45  ;;  %1397 = vst [vmem:[%s2418_s16 + $0xc8] sm:$0xff] %v1365_v19  ;;  %v741_v23 = vadd.f32 %v2301_v20, %v740_v55  ;;  %v1238_v2 = vmul.f32 %v1971_v48, %v2737_v37  ;;  %v1685_v51 = vunpack.c.h.bf16 %v2754_v16  ;;  %v1973_v0 = vpop.eup %1972  ;;  %vm1239_vm13 = vcmp.eq.f32.partialorder %v2737_v37, inf }
 0x140   : > { %v1222_v9 = vsel %vm1220_vm12, %v1221_v6, %v1219_v33  ;;  %v1370_v21 = vadd.f32 %v1338_v5, %v749_v39  ;;  %v1242_v29 = vand.u32 2147483648, %v2737_v37  ;;  %vm1241_vm14 = vcmp.eq.f32.partialorder %v2737_v37, 0.0 }
 0x141   : > { %v1336_v34 = vmul.f32 %v1680_v7, %v1222_v9  ;;  %v1240_v13 = vsel %vm1239_vm13, %v2737_v37, %v1238_v2  ;;  %v1224_v28 = vmul.f32 %v1973_v0, %v2745_v59  ;;  %v1681_v47 = vunpack.c.h.bf16 %v2776_v22 }
 0x142   : > { %1402 = vst [vmem:[%s2418_s16 + $0xf0] sm:$0xff] %v1370_v21  ;;  %v1243_v16 = vsel %vm1241_vm14, %v1242_v29, %v1240_v13  ;;  %vm1225_vm15 = vcmp.eq.f32.partialorder %v2745_v59, inf  ;;  %v1228_v3 = vand.u32 2147483648, %v2745_v59  ;;  %v752_v35 = vadd.f32 %v1776_v27, %v2301_v20 }
 0x143   : > { %v1368_v52 = vadd.f32 %v1336_v34, %v741_v23  ;;  %v1339_v10 = vmul.f32 %v1685_v51, %v1243_v16  ;;  %v1226_v37 = vsel %vm1225_vm15, %v2745_v59, %v1224_v28  ;;  %vm1227_vm0 = vcmp.eq.f32.partialorder %v2745_v59, 0.0 }
 0x144   : > { %v1229_v24 = vsel %vm1227_vm0, %v1228_v3, %v1226_v37  ;;  %v744_v56 = vadd.f32 %v2301_v20, %v743_v62 }
 0x145   : > { %1400 = vst [vmem:[%s2418_s16 + $0xe0] sm:$0xff] %v1368_v52  ;;  %v1371_v15 = vadd.f32 %v1339_v10, %v752_v35  ;;  %v1337_v8 = vmul.f32 %v1681_v47, %v1229_v24 }
 0x147   : > { %1403 = vst [vmem:[%s2418_s16 + $0xf8] sm:$0xff] %v1371_v15  ;;  %v1369_v59 = vadd.f32 %v1337_v8, %v744_v56 }
 0x149   : > { %1401 = vst [vmem:[%s2418_s16 + $0xe8] sm:$0xff] %v1369_v59 }
 0x14a   : > { %1987 = shalt.err (!%p1984_p5)
}
 0x14b   : > { %s1988_s12 = scalar_lea.hbm %s2824_s29, 4096  ;;  %s1992_s14 = scalar_lea.hbm %s2882_s5, 8192 }
 0x14c   : > { %p1989_p6 = scmp.ne.s32.totalorder %s2824_s29, %s1988_s12  ;;  %p1993_p10 = scmp.lt.s32.totalorder %s2824_s29, %s2882_s5 }
 0x14d   : > { %p1994_p11 = scmp.lt.s32.totalorder %s1992_s14, %s1988_s12 }
 0x14e   : > { %p1990_p7 = pnand %p1989_p6, %p2125_p4 }
 0x14f   : > { %p1995_p12 = por %p1994_p11, %p1993_p10 }
 0x150   : > { %p1991_p9 = pneg %p1990_p7 }
 0x152   : > { %p1996_p13 = pnand %p1995_p12, %p1991_p9 }
 0x154   : > { %1999 = shalt.err (!%p1996_p13)
}
 0x155   : > { %s2053_s17 = smov 128   ;;  %s2054_s25 = smov 8  }
 0x156   : > { %1815 = dma.vmem_to_hbm [thread:$0]  (%p2125_p4), %s2826_s24, 4096, %s2824_s29, %s2832_s21, %s2053_s17, %s2053_s17, %s2054_s25  }
 0x157 PF: > { %p1821_p0 = scmp.ge.s32.totalorder %s2050_s23, 2  ;;  %s1434_s27 = sand.u32 1, %s2030_s18  }
 0x158   : > { %s1435_s7 = scalar_lea.sflag [#allocation3], %s1434_s27 }
 0x159   : > { %p1818_p1 = pnand %p1821_p0, %p2132_p8 }
 0x15b   : > { %p1819_p2 = pneg %p1818_p1 }
 0x15d   : > { %2025 = dma.done.wait (%p1819_p2), %s1435_s7, 4096  }
 0x15e   : > { %2027 = vsyncadd (%p1819_p2), %s1435_s7, 4294963200  ;;  %s18_s23 = sadd.s32 1, %s2050_s23   ;;  %s2900_s18 = smov %s2034_s19 }
 0x15f   : > { %p15_p3 = scmp.ge.s32.totalorder %s18_s23, 4   ;;  %s2901_s19 = smov %s2038_s20 }
 0x160   : > { %s2902_s20 = smov %s2138_s6  ;;  %s2903_s21 = smov %s2046_s22 }
 0x161   : > { %s2904_s22 = smov %s2906_s26  ;;  %17 = sbr.rel (!%p15_p3) target bundleno = 4 (0x4), region = 87 }
 0x166   :  { %1440 = vsyncpa [#allocation3], 1 }
 0x167   :  { %1442 = vsyncpa [#allocation3 + $0x1], 1 }

</bundles_post_ra>
